<compile_context>
chip_gen: v5e
topology: v5e:2x2
jax: 0.10.0
libtpu: 0.0.40
codegen_flags: <defaults>
</compile_context>

<pallas_src>
import functools

import jax
import jax.numpy as jnp
from jax import lax
from jax.experimental import pallas as pl
from jax.experimental.pallas import tpu as pltpu

LANE = 128
_LAYER_DIMS = [(12, 32), (32, 32), (32, 32), (32, 16)]  # (fan_in, fan_out); layer 5 appended later


def _round_up(n, m):
    return ((n + m - 1) // m) * m


def _mlp_kernel(x_ref, w_ref, b_ref, o_ref):
    """One batch tile.  x_ref: (tile, 12) batch-major.  Compute feature-major: h = (32, tile)."""
    num_layers = w_ref.shape[0]
    in_f = x_ref.shape[1]
    out_rows = o_ref.shape[0]

    x = x_ref[...].astype(jnp.bfloat16)                         # bf16 MXU operand, (tile, in_f)
    # Layer 1 also performs the batch-major -> feature-major transpose on the MXU:
    #   (f_pad, in_f) . (tile, in_f)^T -> (f_pad, tile), f32 accumulation.
    acc = lax.dot_general(
        w_ref[0][:, :in_f], x,
        dimension_numbers=(((1,), (1,)), ((), ())),
        preferred_element_type=jnp.float32,
    ) + b_ref[0]                                                 # f32 bias add (lane broadcast)
    h = jnp.maximum(acc, 0.0).astype(jnp.bfloat16)               # f32 ReLU, bf16 for next MXU op

    for layer in range(1, num_layers):                           # static Python loop -> unrolled
        acc = jnp.dot(w_ref[layer], h, preferred_element_type=jnp.float32) + b_ref[layer]
        if layer < num_layers - 1:
            h = jnp.maximum(acc, 0.0).astype(jnp.bfloat16)
        else:
            o_ref[...] = acc[:out_rows, :]                       # lane-dense f32 store, 8 rows


@functools.partial(jax.jit, static_argnames=("out_features", "batch_tile", "feature_major"))
def direct_classifier_forward(x, wslab, bslab, *, out_features, batch_tile=8192,
                              feature_major=False):
    """x: [B, 12] f32 (batch-major, as produced by the PyTorch module's caller).
    wslab: [5, 32, 32] bf16 zero-padded weights.  bslab: [5, 32, 1] f32 zero-padded biases.
    Returns [B, out_features] f32 (or the feature-major (out_rows, B) slab if feature_major)."""
    B, in_f = x.shape
    f_pad = wslab.shape[1]
    assert in_f == _LAYER_DIMS[0][0], "DirectClasisfier expects 12 input features"
    assert out_features <= f_pad
    out_rows = _round_up(max(out_features, 1), 8)

    # ---- batch tile / grid sizing (all trace-time Python ints) -------------------------
    cap = max(LANE, _round_up(batch_tile, LANE))                 # lane-aligned tile cap
    tile = min(cap, max(LANE, _round_up(B, LANE)))
    if B > 2 * LANE:
        # Split whenever possible so both v7x TensorCores get work (moot on v5e/v6e).
        tile = min(tile, max(LANE, _round_up(pl.cdiv(B, 2), LANE)))
    grid = pl.cdiv(B, tile)
    if grid > 1 and grid % 2 == 1:
        # v7x: prefer an even step count for balanced 2-TC sharding; shrink the tile a
        # little rather than adding a fully-padded extra step.
        for cand in range(tile - LANE, LANE - 1, -LANE):
            g = pl.cdiv(B, cand)
            if g % 2 == 0:
                tile, grid = cand, g
                break
            if g > grid + 2:
                break

    out_fm = pl.pallas_call(
        _mlp_kernel,
        out_shape=jax.ShapeDtypeStruct((out_rows, B), jnp.float32),
        grid_spec=pltpu.PrefetchScalarGridSpec(
            num_scalar_prefetch=0,
            grid=(grid,),
            in_specs=[
                # Raw batch-major input; last block may be ragged (partial copy), the
                # corresponding output columns are never consumed.
                pl.BlockSpec((tile, in_f), lambda i: (i, 0)),
                # Weight/bias slabs are grid-invariant: the pipeline skips the re-DMA when
                # the block index does not change between steps.
                pl.BlockSpec(wslab.shape, lambda i: (0, 0, 0)),
                pl.BlockSpec(bslab.shape, lambda i: (0, 0, 0)),
            ],
            out_specs=pl.BlockSpec((out_rows, tile), lambda i: (0, i)),
        ),
        compiler_params=pltpu.CompilerParams(
            dimension_semantics=("parallel",),
        ),
    )(x, wslab, bslab)

    if feature_major:
        # Consumers that can take batch-on-lanes output should use this path and skip the
        # transpose below (it is pure layout plumbing, one extra small HBM round trip).
        return out_fm
    return out_fm[:out_features, :].T


def init_params(key, output_features):
    """Deterministic init matching nn.Linear shapes (PyTorch layout: W (out, in), b (out,))."""
    dims = _LAYER_DIMS + [(16, output_features)]
    params = {}
    for idx, (fan_in, fan_out) in enumerate(dims, start=1):
        key, kw, kb = jax.random.split(key, 3)
        bound = 1.0 / float(fan_in) ** 0.5
        params[f"w{idx}"] = jax.random.uniform(kw, (fan_out, fan_in), jnp.float32, -bound, bound)
        params[f"b{idx}"] = jax.random.uniform(kb, (fan_out,), jnp.float32, -bound, bound)
    return params


def pack_params(params, output_features):
    """Zero-pad every layer to (F_PAD, F_PAD) and stack into two slabs.

    Zero-padded weight rows/cols make the packed network mathematically identical to the
    original (up to the bf16 operand cast)."""
    dims = _LAYER_DIMS + [(16, output_features)]
    # Guard: output_features > 32 would pad every layer quadratically to that size.
    assert output_features <= 32, "pack_params assumes output_features <= 32"
    f_pad = 32
    wslab = jnp.zeros((len(dims), f_pad, f_pad), jnp.float32)
    bslab = jnp.zeros((len(dims), f_pad, 1), jnp.float32)
    for layer, (fan_in, fan_out) in enumerate(dims):
        wslab = wslab.at[layer, :fan_out, :fan_in].set(params[f"w{layer + 1}"])
        bslab = bslab.at[layer, :fan_out, 0].set(params[f"b{layer + 1}"])
    return wslab.astype(jnp.bfloat16), bslab


def reference_forward(x, params):
    """Pure-JAX f32 reference (PyTorch weight layout)."""
    h = x
    for i in range(1, 5):
        h = jnp.maximum(h @ params[f"w{i}"].T + params[f"b{i}"], 0.0)
    return h @ params["w5"].T + params["b5"]


if __name__ == "__main__":
    key = jax.random.PRNGKey(0)
    output_features = 4

    params = init_params(key, output_features)
    wslab, bslab = pack_params(params, output_features)

    # TODO(synk): dropout omitted — identity at inference time (no RNG state in the forward spec).

    # batch=16: single step; batch=300: 2 steps with a ragged tail (default tile cap);
    # batch=1000 @ batch_tile=256: 4-step even grid with a ragged tail.
    cases = [(16, 8192), (300, 8192), (1000, 256)]
    for batch, bt in cases:
        key, kx = jax.random.split(key)
        x = jax.random.normal(kx, (batch, 12), jnp.float32)

        out = direct_classifier_forward(
            x, wslab, bslab, out_features=output_features, batch_tile=bt
        )
        out = jax.block_until_ready(out)

        ref = reference_forward(x, params)
        assert out.shape == (batch, output_features)
        # bf16 MXU operands with f32 accumulation -> loosened tolerance vs f32 reference.
        max_diff = float(jnp.max(jnp.abs(out - ref)))
        assert jnp.allclose(out, ref, atol=5e-2, rtol=5e-2), (
            f"mismatch vs reference at batch={batch}: max abs diff {max_diff}"
        )

    print("KERNEL_OK")
</pallas_src>

<mosaic_0001>
module attributes {stable_mosaic.version = 11 : i64} {
  func.func @_mlp_kernel(%arg0: i32, %arg1: memref<128x12xf32, #tpu.memory_space<vmem>>, %arg2: memref<5x32x32xbf16, #tpu.memory_space<vmem>>, %arg3: memref<5x32x1xf32, #tpu.memory_space<vmem>>, %arg4: memref<8x128xf32, #tpu.memory_space<vmem>>) attributes {dimension_semantics = [#tpu.dimension_semantics<parallel>], iteration_bounds = array<i64: 1>, scalar_prefetch = 0 : i64, scratch_operands = 0 : i64, tpu.core_type = #tpu.core_type<tc>, window_params = [{transform_indices = @transform_0, window_bounds = array<i64: 128, 12>}, {pipeline_mode = #tpu.pipeline_mode<synchronous>, transform_indices = @transform_1, window_bounds = array<i64: 5, 32, 32>}, {pipeline_mode = #tpu.pipeline_mode<synchronous>, transform_indices = @transform_2, window_bounds = array<i64: 5, 32, 1>}, {transform_indices = @transform_3, window_bounds = array<i64: 8, 128>}]} {
    %c0 = arith.constant 0 : index
    %c0_0 = arith.constant 0 : index
    %0 = vector.load %arg1[%c0, %c0_0] : memref<128x12xf32, #tpu.memory_space<vmem>>, vector<128x12xf32>
    %1 = arith.truncf %0 : vector<128x12xf32> to vector<128x12xbf16>
    %c0_1 = arith.constant 0 : index
    %c0_2 = arith.constant 0 : index
    %c0_3 = arith.constant 0 : index
    %2 = vector.load %arg2[%c0_1, %c0_2, %c0_3] : memref<5x32x32xbf16, #tpu.memory_space<vmem>>, vector<1x32x32xbf16>
    %3 = vector.shape_cast %2 : vector<1x32x32xbf16> to vector<32x32xbf16>
    %4 = vector.extract_strided_slice %3 {offsets = [0, 0], sizes = [32, 12], strides = [1, 1]} : vector<32x32xbf16> to vector<32x12xbf16>
    %cst = arith.constant dense<0.000000e+00> : vector<32x128xf32>
    %5 = tpu.matmul %4, %1, %cst {dimension_numbers = #tpu.dot_dimension_numbers<[1], [1], [0], [0], [0, 0, 1, 0], [], []>} : vector<32x12xbf16>, vector<128x12xbf16>, vector<32x128xf32> -> vector<32x128xf32>
    %c0_4 = arith.constant 0 : index
    %c0_5 = arith.constant 0 : index
    %c0_6 = arith.constant 0 : index
    %6 = vector.load %arg3[%c0_4, %c0_5, %c0_6] : memref<5x32x1xf32, #tpu.memory_space<vmem>>, vector<1x32x1xf32>
    %7 = vector.shape_cast %6 : vector<1x32x1xf32> to vector<32x1xf32>
    %8 = vector.broadcast %7 : vector<32x1xf32> to vector<32x128xf32>
    %9 = arith.addf %5, %8 : vector<32x128xf32>
    %cst_7 = arith.constant 0.000000e+00 : f32
    %10 = vector.broadcast %cst_7 : f32 to vector<32x128xf32>
    %11 = arith.maximumf %9, %10 : vector<32x128xf32>
    %12 = arith.truncf %11 : vector<32x128xf32> to vector<32x128xbf16>
    %c1 = arith.constant 1 : index
    %c0_8 = arith.constant 0 : index
    %c0_9 = arith.constant 0 : index
    %13 = vector.load %arg2[%c1, %c0_8, %c0_9] : memref<5x32x32xbf16, #tpu.memory_space<vmem>>, vector<1x32x32xbf16>
    %14 = vector.shape_cast %13 : vector<1x32x32xbf16> to vector<32x32xbf16>
    %cst_10 = arith.constant dense<0.000000e+00> : vector<32x128xf32>
    %15 = tpu.matmul %14, %12, %cst_10 {dimension_numbers = #tpu.dot_dimension_numbers<[1], [0], [0], [1], [0, 0, 1, 1], [], []>} : vector<32x32xbf16>, vector<32x128xbf16>, vector<32x128xf32> -> vector<32x128xf32>
    %c1_11 = arith.constant 1 : index
    %c0_12 = arith.constant 0 : index
    %c0_13 = arith.constant 0 : index
    %16 = vector.load %arg3[%c1_11, %c0_12, %c0_13] : memref<5x32x1xf32, #tpu.memory_space<vmem>>, vector<1x32x1xf32>
    %17 = vector.shape_cast %16 : vector<1x32x1xf32> to vector<32x1xf32>
    %18 = vector.broadcast %17 : vector<32x1xf32> to vector<32x128xf32>
    %19 = arith.addf %15, %18 : vector<32x128xf32>
    %cst_14 = arith.constant 0.000000e+00 : f32
    %20 = vector.broadcast %cst_14 : f32 to vector<32x128xf32>
    %21 = arith.maximumf %19, %20 : vector<32x128xf32>
    %22 = arith.truncf %21 : vector<32x128xf32> to vector<32x128xbf16>
    %c2 = arith.constant 2 : index
    %c0_15 = arith.constant 0 : index
    %c0_16 = arith.constant 0 : index
    %23 = vector.load %arg2[%c2, %c0_15, %c0_16] : memref<5x32x32xbf16, #tpu.memory_space<vmem>>, vector<1x32x32xbf16>
    %24 = vector.shape_cast %23 : vector<1x32x32xbf16> to vector<32x32xbf16>
    %cst_17 = arith.constant dense<0.000000e+00> : vector<32x128xf32>
    %25 = tpu.matmul %24, %22, %cst_17 {dimension_numbers = #tpu.dot_dimension_numbers<[1], [0], [0], [1], [0, 0, 1, 1], [], []>} : vector<32x32xbf16>, vector<32x128xbf16>, vector<32x128xf32> -> vector<32x128xf32>
    %c2_18 = arith.constant 2 : index
    %c0_19 = arith.constant 0 : index
    %c0_20 = arith.constant 0 : index
    %26 = vector.load %arg3[%c2_18, %c0_19, %c0_20] : memref<5x32x1xf32, #tpu.memory_space<vmem>>, vector<1x32x1xf32>
    %27 = vector.shape_cast %26 : vector<1x32x1xf32> to vector<32x1xf32>
    %28 = vector.broadcast %27 : vector<32x1xf32> to vector<32x128xf32>
    %29 = arith.addf %25, %28 : vector<32x128xf32>
    %cst_21 = arith.constant 0.000000e+00 : f32
    %30 = vector.broadcast %cst_21 : f32 to vector<32x128xf32>
    %31 = arith.maximumf %29, %30 : vector<32x128xf32>
    %32 = arith.truncf %31 : vector<32x128xf32> to vector<32x128xbf16>
    %c3 = arith.constant 3 : index
    %c0_22 = arith.constant 0 : index
    %c0_23 = arith.constant 0 : index
    %33 = vector.load %arg2[%c3, %c0_22, %c0_23] : memref<5x32x32xbf16, #tpu.memory_space<vmem>>, vector<1x32x32xbf16>
    %34 = vector.shape_cast %33 : vector<1x32x32xbf16> to vector<32x32xbf16>
    %cst_24 = arith.constant dense<0.000000e+00> : vector<32x128xf32>
    %35 = tpu.matmul %34, %32, %cst_24 {dimension_numbers = #tpu.dot_dimension_numbers<[1], [0], [0], [1], [0, 0, 1, 1], [], []>} : vector<32x32xbf16>, vector<32x128xbf16>, vector<32x128xf32> -> vector<32x128xf32>
    %c3_25 = arith.constant 3 : index
    %c0_26 = arith.constant 0 : index
    %c0_27 = arith.constant 0 : index
    %36 = vector.load %arg3[%c3_25, %c0_26, %c0_27] : memref<5x32x1xf32, #tpu.memory_space<vmem>>, vector<1x32x1xf32>
    %37 = vector.shape_cast %36 : vector<1x32x1xf32> to vector<32x1xf32>
    %38 = vector.broadcast %37 : vector<32x1xf32> to vector<32x128xf32>
    %39 = arith.addf %35, %38 : vector<32x128xf32>
    %cst_28 = arith.constant 0.000000e+00 : f32
    %40 = vector.broadcast %cst_28 : f32 to vector<32x128xf32>
    %41 = arith.maximumf %39, %40 : vector<32x128xf32>
    %42 = arith.truncf %41 : vector<32x128xf32> to vector<32x128xbf16>
    %c4 = arith.constant 4 : index
    %c0_29 = arith.constant 0 : index
    %c0_30 = arith.constant 0 : index
    %43 = vector.load %arg2[%c4, %c0_29, %c0_30] : memref<5x32x32xbf16, #tpu.memory_space<vmem>>, vector<1x32x32xbf16>
    %44 = vector.shape_cast %43 : vector<1x32x32xbf16> to vector<32x32xbf16>
    %cst_31 = arith.constant dense<0.000000e+00> : vector<32x128xf32>
    %45 = tpu.matmul %44, %42, %cst_31 {dimension_numbers = #tpu.dot_dimension_numbers<[1], [0], [0], [1], [0, 0, 1, 1], [], []>} : vector<32x32xbf16>, vector<32x128xbf16>, vector<32x128xf32> -> vector<32x128xf32>
    %c4_32 = arith.constant 4 : index
    %c0_33 = arith.constant 0 : index
    %c0_34 = arith.constant 0 : index
    %46 = vector.load %arg3[%c4_32, %c0_33, %c0_34] : memref<5x32x1xf32, #tpu.memory_space<vmem>>, vector<1x32x1xf32>
    %47 = vector.shape_cast %46 : vector<1x32x1xf32> to vector<32x1xf32>
    %48 = vector.broadcast %47 : vector<32x1xf32> to vector<32x128xf32>
    %49 = arith.addf %45, %48 : vector<32x128xf32>
    %50 = vector.extract_strided_slice %49 {offsets = [0, 0], sizes = [8, 128], strides = [1, 1]} : vector<32x128xf32> to vector<8x128xf32>
    %c0_35 = arith.constant 0 : index
    %c0_36 = arith.constant 0 : index
    %51 = vector.load %arg4[%c0_35, %c0_36] : memref<8x128xf32, #tpu.memory_space<vmem>>, vector<8x128xf32>
    tpu.vector_store %arg4[%c0_35, %c0_36], %50 {strides = array<i32>} : memref<8x128xf32, #tpu.memory_space<vmem>>, vector<8x128xf32>,
    return
  }
  func.func @transform_0(%arg0: i32) -> (i32, i32) {
    %c0_i32 = arith.constant 0 : i32
    %c0_i32_0 = arith.constant 0 : i32
    return %arg0, %c0_i32 : i32, i32
  }
  func.func @transform_1(%arg0: i32) -> (i32, i32, i32) {
    %c0_i32 = arith.constant 0 : i32
    %c0_i32_0 = arith.constant 0 : i32
    %c0_i32_1 = arith.constant 0 : i32
    %c0_i32_2 = arith.constant 0 : i32
    return %c0_i32, %c0_i32_0, %c0_i32_1 : i32, i32, i32
  }
  func.func @transform_2(%arg0: i32) -> (i32, i32, i32) {
    %c0_i32 = arith.constant 0 : i32
    %c0_i32_0 = arith.constant 0 : i32
    %c0_i32_1 = arith.constant 0 : i32
    %c0_i32_2 = arith.constant 0 : i32
    return %c0_i32, %c0_i32_0, %c0_i32_1 : i32, i32, i32
  }
  func.func @transform_3(%arg0: i32) -> (i32, i32) {
    %c0_i32 = arith.constant 0 : i32
    %c0_i32_0 = arith.constant 0 : i32
    return %c0_i32, %arg0 : i32, i32
  }
}

</mosaic_0001>

<bundles_post_ra>
// kernel: direct_classifier_forward.1
= control target key start
LH: loop header
LB: loop body
LE: loop exit
PB: predicated region body
PF: predicated region fallthrough
CT: control target
= control target key end

     0   :  { %vm77_vm0 = vcmask 97280   ;;  %v507_v17 = vmov 0   ;;  %vm173_vm1 = vcmask 261120   ;;  %s678_s0 = inlined_call_operand.vmem [shape: f32[16,12], index: 0, kind: input, shape index: {}]   ;;  %s679_s2 = inlined_call_operand.vmem [shape: f32[5,32,1], index: 2, kind: input, shape index: {}]   ;;  %s680_s1 = inlined_call_operand.vmem [shape: bf16[5,32,32], index: 1, kind: input, shape index: {}]   ;;  %s681_s3 = inlined_call_operand.vmem [shape: f32[8,16], index: 3, kind: output, shape index: {}]  }
   0x1   :  { %v29_v0 = vld [vmem:[%s678_s0 + $0x70] sm:$0xff]  ;;  %v30_v1 = vld [vmem:[%s678_s0 + $0x78] sm:$0xff]  ;;  %v27_v3 = vld [vmem:[%s678_s0 + $0x60] sm:$0xff]  ;;  %504 = vset.pattern.permute.xlu0 %v507_v17  ;;  %505 = vset.pattern.permute.xlu1 %v507_v17 }
   0x2   :  { %v38_v2 = vpack.c.bf16 %v30_v1, %v29_v0  ;;  %v28_v4 = vld [vmem:[%s678_s0 + $0x68] sm:$0xff]  ;;  %v25_v8 = vld [vmem:[%s678_s0 + $0x50] sm:$0xff]  ;;  %v26_v9 = vld [vmem:[%s678_s0 + $0x58] sm:$0xff]  ;;  %506 = vset.pattern.permute.xlu2 %v507_v17 }
   0x3   :  { %v37_v6 = vpack.c.bf16 %v28_v4, %v27_v3  ;;  %v36_v10 = vpack.c.bf16 %v26_v9, %v25_v8  ;;  %v23_v12 = vld [vmem:[%s678_s0 + $0x40] sm:$0xff]  ;;  %v24_v13 = vld [vmem:[%s678_s0 + $0x48] sm:$0xff]  ;;  %v45_v14 = vld [vmem:[%s679_s2 + $0x10] sm:$0xff] }
   0x4   :  { %v106_v5 = vsel %vm77_vm0, %v38_v2, 0  ;;  %v43_v15 = vld [vmem:[%s679_s2] sm:$0xff]  ;;  %v35_v16 = vpack.c.bf16 %v24_v13, %v23_v12  ;;  %59 = vperm.xlu0 %504, %v45_v14   ;;  %v21_v19 = vld [vmem:[%s678_s0 + $0x30] sm:$0xff]  ;;  %v22_v20 = vld [vmem:[%s678_s0 + $0x38] sm:$0xff] }
   0x5   :  { %108 = vmatpush.bf16.xpose.msra.mxu0 %v106_v5  ;;  %v103_v7 = vsel %vm77_vm0, %v37_v6, 0  ;;  %v100_v11 = vsel %vm77_vm0, %v36_v10, 0  ;;  %49 = vperm.xlu1 %505, %v43_v15   ;;  %v46_v21 = vld [vmem:[%s679_s2 + $0x18] sm:$0xff]  ;;  %v44_v22 = vld [vmem:[%s679_s2 + $0x8] sm:$0xff]  ;;  %v34_v23 = vpack.c.bf16 %v22_v20, %v21_v19  ;;  %v19_v25 = vld [vmem:[%s678_s0 + $0x20] sm:$0xff] }
   0x6   :  { %v97_v18 = vsel %vm77_vm0, %v35_v16, 0  ;;  %v20_v26 = vld [vmem:[%s678_s0 + $0x28] sm:$0xff]  ;;  %v425_v27 = vld [vmem:[%s679_s2 + $0x20] sm:$0xff]  ;;  %v17_v31 = vld [vmem:[%s678_s0 + $0x10] sm:$0xff] }
   0x7   :  { %v94_v24 = vsel %vm77_vm0, %v34_v23, 0  ;;  %v426_v28 = vld [vmem:[%s679_s2 + $0x28] sm:$0xff]  ;;  %v33_v29 = vpack.c.bf16 %v20_v26, %v19_v25  ;;  %v18_v32 = vld [vmem:[%s678_s0 + $0x18] sm:$0xff]  ;;  %v443_v34 = vld [vmem:[%s679_s2 + $0x40] sm:$0xff] }
   0x8   :  { %v446_v33 = vld [vmem:[%s679_s2 + $0x58] sm:$0xff]  ;;  %v32_v35 = vpack.c.bf16 %v18_v32, %v17_v31  ;;  %v15_v37 = vld [vmem:[%s678_s0] sm:$0xff]  ;;  %v16_v38 = vld [vmem:[%s678_s0 + $0x8] sm:$0xff] }
   0x9   :  { %v91_v30 = vsel %vm77_vm0, %v33_v29, 0  ;;  %v463_v39 = vld [vmem:[%s679_s2 + $0x70] sm:$0xff]  ;;  %v464_v40 = vld [vmem:[%s679_s2 + $0x78] sm:$0xff]  ;;  %v31_v41 = vpack.c.bf16 %v16_v38, %v15_v37  ;;  %v462_v43 = vld [vmem:[%s679_s2 + $0x68] sm:$0xff] }
   0xa   :  { %v88_v36 = vsel %vm77_vm0, %v32_v35, 0  ;;  %v479_v44 = vld [vmem:[%s679_s2 + $0x80] sm:$0xff]  ;;  %v494_v46 = vld [vmem:[%s680_s1 + $0x8] sm:$0xff]  ;;  %v427_v52 = vld [vmem:[%s679_s2 + $0x30] sm:$0xff] }
   0xb   :  { %v85_v42 = vsel %vm77_vm0, %v31_v41, 0  ;;  %v493_v45 = vld [vmem:[%s680_s1] sm:$0xff]  ;;  %155 = vperm.xlu2 %506, %v427_v52   ;;  %v428_v62 = vld [vmem:[%s679_s2 + $0x38] sm:$0xff]  ;;  %v495_v3 = vld [vmem:[%s680_s1 + $0x10] sm:$0xff] }
   0xc   :  { %64 = vperm.xlu0 %504, %v46_v21   ;;  %v445_v4 = vld [vmem:[%s679_s2 + $0x50] sm:$0xff]  ;;  %v444_v5 = vld [vmem:[%s679_s2 + $0x48] sm:$0xff]  ;;  %v496_v6 = vld [vmem:[%s680_s1 + $0x18] sm:$0xff] }
   0xd   :  { %109 = vmatpush.bf16.xpose.msra.mxu0 %v103_v7  ;;  %54 = vperm.xlu1 %505, %v44_v22   ;;  %v461_v7 = vld [vmem:[%s679_s2 + $0x60] sm:$0xff] }
   0xe   :  { %v497_v26 = vld [vmem:[%s680_s1 + $0x20] sm:$0xff] }
  0x13   :  { %160 = vperm.xlu2 %506, %v428_v62  }
  0x14   :  { %145 = vperm.xlu0 %504, %v425_v27   ;;  %v498_v27 = vld [vmem:[%s680_s1 + $0x28] sm:$0xff] }
  0x15   :  { %110 = vmatpush.bf16.xpose.msra.mxu0 %v100_v11  ;;  %150 = vperm.xlu1 %505, %v426_v28  }
  0x1b   :  { %227 = vperm.xlu2 %506, %v445_v4  }
  0x1c   :  { %232 = vperm.xlu0 %504, %v446_v33  }
  0x1d   :  { %111 = vmatpush.bf16.xpose.msra.mxu0 %v97_v18  ;;  %217 = vperm.xlu1 %505, %v443_v34  }
  0x23   :  { %222 = vperm.xlu2 %506, %v444_v5  }
  0x24   :  { %298 = vperm.xlu0 %504, %v463_v39  }
  0x25   :  { %112 = vmatpush.bf16.xpose.msra.mxu0 %v94_v24  ;;  %303 = vperm.xlu1 %505, %v464_v40  }
  0x2b   :  { %288 = vperm.xlu2 %506, %v461_v7  }
  0x2c   :  { %293 = vperm.xlu0 %504, %v462_v43  }
  0x2d   :  { %113 = vmatpush.bf16.xpose.msra.mxu0 %v91_v30  ;;  %359 = vperm.xlu1 %505, %v479_v44  }
  0x35   :  { %114 = vmatpush.bf16.xpose.msra.mxu0 %v88_v36 }
  0x3d   :  { %115 = vmatpush.bf16.xpose.msra.mxu0 %v85_v42 }
  0x44   :  { %419 = vmatmul.msk.bf16.vlgmr.msra.gmra.mxu0 %vm77_vm0, %v493_v45 }
  0x54   :  { %420 = vmatmul.msk.bf16.gmra.mxu0 %vm77_vm0, %v494_v46  ;;  %v499_v46 = vld [vmem:[%s680_s1 + $0x30] sm:$0xff] }
  0x65   :  { %v156_v10 = vpop.permute.xlu2 %155 }
  0x6d   :  { %v161_v14 = vpop.permute.xlu2 %160 }
  0x75   :  { %v228_v30 = vpop.permute.xlu2 %227 }
  0x76   :  { %v60_v49 = vpop.permute.xlu0 %59 }
  0x77   :  { %v50_v50 = vpop.permute.xlu1 %49 }
  0x7d   :  { %v223_v34 = vpop.permute.xlu2 %222 }
  0x7e   :  { %v65_v53 = vpop.permute.xlu0 %64 }
  0x7f   :  { %v55_v55 = vpop.permute.xlu1 %54 }
  0x86   :  { %v146_v18 = vpop.permute.xlu0 %145 }
  0x87   :  { %v151_v12 = vpop.permute.xlu1 %150 }
  0x8e   :  { %v233_v32 = vpop.permute.xlu0 %232 }
  0x8f   :  { %v218_v38 = vpop.permute.xlu1 %217 }
  0x97   :  { %v304_v52 = vpop.permute.xlu1 %303 }
  0x9f   :  { %v360_v4 = vpop.permute.xlu1 %359 }
  0xc1   :  { %v117_v47 = vpop.f32.mrf.mxu0 }
  0xc2   :  { %v118_v59 = vadd.f32 %v117_v47, %v50_v50  ;;  %v500_v47 = vld [vmem:[%s680_s1 + $0x38] sm:$0xff]  ;;  %v299_v50 = vpop.permute.xlu0 %298 }
  0xc4   :  { %v127_v1 = vmax.f32 %v118_v59, 0.0 }
  0xc9   :  { %v119_v48 = vpop.f32.mrf.mxu0 }
  0xca   :  { %v120_v57 = vadd.f32 %v119_v48, %v55_v55 }
  0xcc   :  { %v128_v63 = vmax.f32 %v120_v57, 0.0 }
  0xce   :  { %v131_v2 = vpack.c.bf16 %v128_v63, %v127_v1 }
  0xd1   :  { %v122_v51 = vpop.f32.mrf.mxu0 }
  0xd2   :  { %v123_v54 = vadd.f32 %v122_v51, %v60_v49 }
  0xd4   :  { %v129_v60 = vmax.f32 %v123_v54, 0.0  ;;  %v294_v54 = vpop.permute.xlu0 %293 }
  0xd9   :  { %v124_v56 = vpop.f32.mrf.mxu0 }
  0xda   :  { %v125_v58 = vadd.f32 %v124_v56, %v65_v53 }
  0xdc   :  { %v130_v61 = vmax.f32 %v125_v58, 0.0  ;;  %v289_v58 = vpop.permute.xlu2 %288 }
  0xde   :  { %v132_v0 = vpack.c.bf16 %v130_v61, %v129_v60 }
  0xe0   :  { %186 = vmatpush.bf16.msra.mxu1 %v132_v0 }
  0xe4   :  { %187 = vmatpush.bf16.msra.mxu1 %v131_v2  ;;  %v501_v2 = vld [vmem:[%s680_s1 + $0x40] sm:$0xff] }
  0xe7   :  { %437 = vmatmul.msk.bf16.vlgmr.msra.gmra.mxu1 %vm173_vm1, %v495_v3  ;;  %v502_v3 = vld [vmem:[%s680_s1 + $0x48] sm:$0xff] }
  0xf7   :  { %438 = vmatmul.msk.bf16.gmra.mxu1 %vm173_vm1, %v496_v6 }
 0x164   :  { %v189_v8 = vpop.f32.mrf.mxu1 }
 0x165   :  { %v190_v19 = vadd.f32 %v189_v8, %v146_v18 }
 0x167   :  { %v199_v24 = vmax.f32 %v190_v19, 0.0 }
 0x16c   :  { %v191_v9 = vpop.f32.mrf.mxu1 }
 0x16d   :  { %v192_v16 = vadd.f32 %v191_v9, %v151_v12 }
 0x16f   :  { %v200_v22 = vmax.f32 %v192_v16, 0.0 }
 0x171   :  { %v203_v25 = vpack.c.bf16 %v200_v22, %v199_v24 }
 0x174   :  { %v194_v11 = vpop.f32.mrf.mxu1 }
 0x175   :  { %v195_v13 = vadd.f32 %v194_v11, %v156_v10 }
 0x177   :  { %v201_v20 = vmax.f32 %v195_v13, 0.0 }
 0x17c   :  { %v196_v15 = vpop.f32.mrf.mxu1 }
 0x17d   :  { %v197_v17 = vadd.f32 %v196_v15, %v161_v14 }
 0x17f   :  { %v202_v21 = vmax.f32 %v197_v17, 0.0 }
 0x181   :  { %v204_v23 = vpack.c.bf16 %v202_v21, %v201_v20 }
 0x183   :  { %257 = vmatpush.bf16.msra.mxu2 %v204_v23 }
 0x187   :  { %258 = vmatpush.bf16.msra.mxu2 %v203_v25 }
 0x18a   :  { %455 = vmatmul.msk.bf16.vlgmr.msra.gmra.mxu2 %vm173_vm1, %v497_v26 }
 0x19a   :  { %456 = vmatmul.msk.bf16.gmra.mxu2 %vm173_vm1, %v498_v27 }
 0x20d   :  { %v260_v28 = vpop.f32.mrf.mxu2 }
 0x20e   :  { %v261_v39 = vadd.f32 %v260_v28, %v218_v38 }
 0x210   :  { %v270_v44 = vmax.f32 %v261_v39, 0.0 }
 0x215   :  { %v262_v29 = vpop.f32.mrf.mxu2 }
 0x216   :  { %v263_v36 = vadd.f32 %v262_v29, %v223_v34 }
 0x218   :  { %v271_v42 = vmax.f32 %v263_v36, 0.0 }
 0x21a   :  { %v274_v45 = vpack.c.bf16 %v271_v42, %v270_v44 }
 0x21d   :  { %v265_v31 = vpop.f32.mrf.mxu2 }
 0x21e   :  { %v266_v33 = vadd.f32 %v265_v31, %v228_v30 }
 0x220   :  { %v272_v40 = vmax.f32 %v266_v33, 0.0 }
 0x225   :  { %v267_v35 = vpop.f32.mrf.mxu2 }
 0x226   :  { %v268_v37 = vadd.f32 %v267_v35, %v233_v32 }
 0x228   :  { %v273_v41 = vmax.f32 %v268_v37, 0.0 }
 0x22a   :  { %v275_v43 = vpack.c.bf16 %v273_v41, %v272_v40 }
 0x22c   :  { %328 = vmatpush.bf16.msra.mxu3 %v275_v43 }
 0x230   :  { %329 = vmatpush.bf16.msra.mxu3 %v274_v45 }
 0x233   :  { %473 = vmatmul.msk.bf16.vlgmr.msra.gmra.mxu3 %vm173_vm1, %v499_v46 }
 0x243   :  { %474 = vmatmul.msk.bf16.gmra.mxu3 %vm173_vm1, %v500_v47 }
 0x2b6   :  { %v331_v48 = vpop.f32.mrf.mxu3 }
 0x2b7   :  { %v332_v59 = vadd.f32 %v331_v48, %v289_v58 }
 0x2b9   :  { %v341_v0 = vmax.f32 %v332_v59, 0.0 }
 0x2be   :  { %v333_v49 = vpop.f32.mrf.mxu3 }
 0x2bf   :  { %v334_v56 = vadd.f32 %v333_v49, %v294_v54 }
 0x2c1   :  { %v342_v62 = vmax.f32 %v334_v56, 0.0 }
 0x2c3   :  { %v345_v1 = vpack.c.bf16 %v342_v62, %v341_v0 }
 0x2c6   :  { %v336_v51 = vpop.f32.mrf.mxu3 }
 0x2c7   :  { %v337_v53 = vadd.f32 %v336_v51, %v299_v50 }
 0x2c9   :  { %v343_v60 = vmax.f32 %v337_v53, 0.0 }
 0x2ce   :  { %v338_v55 = vpop.f32.mrf.mxu3 }
 0x2cf   :  { %v339_v57 = vadd.f32 %v338_v55, %v304_v52 }
 0x2d1   :  { %v344_v61 = vmax.f32 %v339_v57, 0.0 }
 0x2d3   :  { %v346_v63 = vpack.c.bf16 %v344_v61, %v343_v60 }
 0x2d5   :  { %396 = vmatpush.bf16.msrb.mxu1 %v346_v63 }
 0x2d9   :  { %397 = vmatpush.bf16.msrb.mxu1 %v345_v1 }
 0x2dc   :  { %491 = vmatmul.msk.bf16.vlgmr.msrb.gmra.mxu1 %vm173_vm1, %v501_v2 }
 0x2ec   :  { %492 = vmatmul.msk.bf16.gmra.mxu1 %vm173_vm1, %v502_v3 }
 0x359   :  { %v399_v5 = vpop.f32.mrf.mxu1 }
 0x35a   :  { %v400_v6 = vadd.f32 %v399_v5, %v360_v4 }
 0x35c   :  { %406 = vst [vmem:[%s681_s3] sm:$0xff] %v400_v6 }
 0x361   :  { %v401_v7 = vpop.f32.mrf.mxu1 }
 0x369   :  { %v403_v8 = vpop.f32.mrf.mxu1 }
 0x371   :  { %v404_v9 = vpop.f32.mrf.mxu1 }

</bundles_post_ra>
